<compile_context>
chip_gen: v6e
topology: v6e:2x2x1
jax: 0.10.0
libtpu: 0.0.40
codegen_flags: <defaults>
</compile_context>

<pallas_src>
import jax
import jax.numpy as jnp
from jax.experimental import pallas as pl
from jax.experimental.pallas import tpu as pltpu

EMBED_DIM = 32
HEAD_DIM = 16


def _head_kernel(x_ref, wqkv_ref, bias_ref, o_ref):
    # x_ref: (B*T, C)  wqkv_ref: (3, C, H)  bias_ref: (B*T, B*T)  o_ref: (B*T, H)
    x = x_ref[...]

    # Three lane-aligned projections; the Q slab already carries 1/sqrt(H).
    q = jnp.dot(x, wqkv_ref[0], preferred_element_type=jnp.float32)   # (BT, H)
    k = jnp.dot(x, wqkv_ref[1], preferred_element_type=jnp.float32)   # (BT, H)
    v = jnp.dot(x, wqkv_ref[2], preferred_element_type=jnp.float32)   # (BT, H)

    # Block-diagonal attention over all B*T rows in one shot: contract the head
    # axes directly (MXU trans_b, no XLU transpose), add precomputed bias
    # (causal mask within a batch, -1e30 across batches).
    scores = jax.lax.dot_general(
        q, k,
        dimension_numbers=(((1,), (1,)), ((), ())),
        preferred_element_type=jnp.float32) + bias_ref[...]           # (BT, BT)

    # Numerically-stable softmax; reciprocal goes to the EUP slot.
    m = jnp.max(scores, axis=-1, keepdims=True)
    p = jnp.exp(scores - m)
    denom = jnp.sum(p, axis=-1, keepdims=True)
    probs = p * pl.reciprocal(denom, approx=True)

    # out = probs @ V   (dropout is identity in eval mode)
    out = jnp.dot(probs, v, preferred_element_type=jnp.float32)       # (BT, H)
    o_ref[...] = out.astype(o_ref.dtype)


def make_head_params(wq, wk, wv, attn_mask, batch, seq):
    """One-time parameter prep (hoisted out of the forward hot path).

    wq/wk/wv: (H, C) nn.Linear weights.  attn_mask: (T, T) int (0 = masked) or
    None.  Returns (wqkv, bias) ready to pass straight into head_forward.
    """
    H, C = wq.shape
    inv_scale = 1.0 / (float(H) ** 0.5)

    # (3, C, H) slabs; scale folded into the Q slab so the kernel skips it.
    wqkv = jnp.stack([wq.T * inv_scale, wk.T, wv.T], axis=0).astype(jnp.float32)

    # Additive bias block for one batch: 0 where attended, -1e30 where masked
    # (finite, so no NaN for fully-masked rows).
    if attn_mask is None:
        blk = jnp.zeros((seq, seq), dtype=jnp.float32)
    else:
        blk = jnp.where(attn_mask[:seq, :seq] == 0, -1e30, 0.0).astype(jnp.float32)

    # Block-diagonal (B*T, B*T) bias: causal block on the diagonal, -1e30 off
    # the diagonal so cross-batch scores vanish after softmax.
    n = batch * seq
    row_b = jnp.arange(n)[:, None] // seq
    col_b = jnp.arange(n)[None, :] // seq
    bias = jnp.where(row_b == col_b, jnp.tile(blk, (batch, batch)),
                     jnp.float32(-1e30))
    return wqkv, bias


@jax.jit
def head_forward(x, wqkv, bias):
    """x: (B, T, C) float32; wqkv: (3, C, H); bias: (B*T, B*T)."""
    B, T, C = x.shape
    H = wqkv.shape[-1]
    n = B * T

    # Collapse batch into the sublane axis; reshape is metadata-only.
    x2d = x.reshape(n, C)

    out2d = pl.pallas_call(
        _head_kernel,
        out_shape=jax.ShapeDtypeStruct((n, H), x.dtype),
        grid_spec=pltpu.PrefetchScalarGridSpec(
            num_scalar_prefetch=0,
            grid=(1,),                                      # single step: everything fits in VMEM
            in_specs=[
                pl.BlockSpec((n, C), lambda i: (0, 0)),          # x, whole batch
                pl.BlockSpec((3, C, H), lambda i: (0, 0, 0)),    # Q/K/V weight slabs
                pl.BlockSpec((n, n), lambda i: (0, 0)),          # block-diagonal bias
            ],
            out_specs=pl.BlockSpec((n, H), lambda i: (0, 0)),
        ),
        compiler_params=pltpu.CompilerParams(
            dimension_semantics=("arbitrary",)),
    )(x2d, wqkv, bias)

    return out2d.reshape(B, T, H)


def _reference(x, wq, wk, wv, attn_mask, scale):
    q = x @ wq.T
    k = x @ wk.T
    v = x @ wv.T
    scores = (q @ jnp.swapaxes(k, -2, -1)) / scale
    if attn_mask is not None:
        scores = jnp.where(attn_mask[None, :, :] == 0, -jnp.inf, scores)
    probs = jax.nn.softmax(scores, axis=-1)
    return probs @ v


if __name__ == "__main__":
    B, T, C, H = 2, 8, EMBED_DIM, HEAD_DIM

    key = jax.random.PRNGKey(0)
    kx, kq, kk, kv = jax.random.split(key, 4)

    x = jax.random.normal(kx, (B, T, C), dtype=jnp.float32)

    # Deterministic nn.Linear-style init: U(-1/sqrt(in), 1/sqrt(in)), shape (out, in)
    bound = 1.0 / (C ** 0.5)
    wq = jax.random.uniform(kq, (H, C), minval=-bound, maxval=bound, dtype=jnp.float32)
    wk = jax.random.uniform(kk, (H, C), minval=-bound, maxval=bound, dtype=jnp.float32)
    wv = jax.random.uniform(kv, (H, C), minval=-bound, maxval=bound, dtype=jnp.float32)

    # Causal attention mask (typical usage of this Head module).
    attn_mask = jnp.tril(jnp.ones((T, T), dtype=jnp.int32))

    # One-time prep (NOT in the per-call hot path).
    wqkv, bias = make_head_params(wq, wk, wv, attn_mask, B, T)

    out = head_forward(x, wqkv, bias)
    out = jax.block_until_ready(out)

    ref = _reference(x, wq, wk, wv, attn_mask, float(H) ** 0.5)
    assert out.shape == (B, T, H)
    # Tolerance accounts for pl.reciprocal(approx=True) (~1e-4 relative).
    assert jnp.allclose(out, ref, atol=2e-3, rtol=2e-3), "mismatch vs reference"

    print("KERNEL_OK")
</pallas_src>

<mosaic_0001>
module attributes {stable_mosaic.version = 11 : i64} {
  func.func @_head_kernel(%arg0: i32, %arg1: memref<16x32xf32, #tpu.memory_space<vmem>>, %arg2: memref<3x32x16xf32, #tpu.memory_space<vmem>>, %arg3: memref<16x16xf32, #tpu.memory_space<vmem>>, %arg4: memref<16x16xf32, #tpu.memory_space<vmem>>) attributes {dimension_semantics = [#tpu.dimension_semantics<arbitrary>], iteration_bounds = array<i64: 1>, scalar_prefetch = 0 : i64, scratch_operands = 0 : i64, tpu.core_type = #tpu.core_type<tc>, window_params = [{pipeline_mode = #tpu.pipeline_mode<synchronous>, transform_indices = @transform_0, window_bounds = array<i64: 16, 32>}, {pipeline_mode = #tpu.pipeline_mode<synchronous>, transform_indices = @transform_1, window_bounds = array<i64: 3, 32, 16>}, {pipeline_mode = #tpu.pipeline_mode<synchronous>, transform_indices = @transform_2, window_bounds = array<i64: 16, 16>}, {pipeline_mode = #tpu.pipeline_mode<synchronous>, transform_indices = @transform_3, window_bounds = array<i64: 16, 16>}]} {
    %c0 = arith.constant 0 : index
    %c0_0 = arith.constant 0 : index
    %0 = vector.load %arg1[%c0, %c0_0] : memref<16x32xf32, #tpu.memory_space<vmem>>, vector<16x32xf32>
    %c0_1 = arith.constant 0 : index
    %c0_2 = arith.constant 0 : index
    %c0_3 = arith.constant 0 : index
    %1 = vector.load %arg2[%c0_1, %c0_2, %c0_3] : memref<3x32x16xf32, #tpu.memory_space<vmem>>, vector<1x32x16xf32>
    %2 = vector.shape_cast %1 : vector<1x32x16xf32> to vector<32x16xf32>
    %cst = arith.constant dense<0.000000e+00> : vector<16x16xf32>
    %3 = tpu.matmul %0, %2, %cst {dimension_numbers = #tpu.dot_dimension_numbers<[1], [0], [0], [1], [0, 0, 1, 1], [], []>} : vector<16x32xf32>, vector<32x16xf32>, vector<16x16xf32> -> vector<16x16xf32>
    %c1 = arith.constant 1 : index
    %c0_4 = arith.constant 0 : index
    %c0_5 = arith.constant 0 : index
    %4 = vector.load %arg2[%c1, %c0_4, %c0_5] : memref<3x32x16xf32, #tpu.memory_space<vmem>>, vector<1x32x16xf32>
    %5 = vector.shape_cast %4 : vector<1x32x16xf32> to vector<32x16xf32>
    %cst_6 = arith.constant dense<0.000000e+00> : vector<16x16xf32>
    %6 = tpu.matmul %0, %5, %cst_6 {dimension_numbers = #tpu.dot_dimension_numbers<[1], [0], [0], [1], [0, 0, 1, 1], [], []>} : vector<16x32xf32>, vector<32x16xf32>, vector<16x16xf32> -> vector<16x16xf32>
    %c2 = arith.constant 2 : index
    %c0_7 = arith.constant 0 : index
    %c0_8 = arith.constant 0 : index
    %7 = vector.load %arg2[%c2, %c0_7, %c0_8] : memref<3x32x16xf32, #tpu.memory_space<vmem>>, vector<1x32x16xf32>
    %8 = vector.shape_cast %7 : vector<1x32x16xf32> to vector<32x16xf32>
    %cst_9 = arith.constant dense<0.000000e+00> : vector<16x16xf32>
    %9 = tpu.matmul %0, %8, %cst_9 {dimension_numbers = #tpu.dot_dimension_numbers<[1], [0], [0], [1], [0, 0, 1, 1], [], []>} : vector<16x32xf32>, vector<32x16xf32>, vector<16x16xf32> -> vector<16x16xf32>
    %cst_10 = arith.constant dense<0.000000e+00> : vector<16x16xf32>
    %10 = tpu.matmul %3, %6, %cst_10 {dimension_numbers = #tpu.dot_dimension_numbers<[1], [1], [0], [0], [0, 0, 1, 0], [], []>} : vector<16x16xf32>, vector<16x16xf32>, vector<16x16xf32> -> vector<16x16xf32>
    %c0_11 = arith.constant 0 : index
    %c0_12 = arith.constant 0 : index
    %11 = vector.load %arg3[%c0_11, %c0_12] : memref<16x16xf32, #tpu.memory_space<vmem>>, vector<16x16xf32>
    %12 = arith.addf %10, %11 : vector<16x16xf32>
    %cst_13 = arith.constant dense<0xFF800000> : vector<16xf32>
    %13 = vector.multi_reduction <maximumf>, %12, %cst_13 [1] : vector<16x16xf32> to vector<16xf32>
    %14 = vector.shape_cast %13 : vector<16xf32> to vector<16x1xf32>
    %15 = vector.broadcast %14 : vector<16x1xf32> to vector<16x16xf32>
    %16 = arith.subf %12, %15 : vector<16x16xf32>
    %17 = math.exp %16 : vector<16x16xf32>
    %cst_14 = arith.constant dense<0.000000e+00> : vector<16xf32>
    %18 = vector.multi_reduction <add>, %17, %cst_14 [1] : vector<16x16xf32> to vector<16xf32>
    %19 = vector.shape_cast %18 : vector<16xf32> to vector<16x1xf32>
    %20 = tpu.reciprocal %19 {approx = true} : vector<16x1xf32> -> vector<16x1xf32>
    %21 = vector.broadcast %20 : vector<16x1xf32> to vector<16x16xf32>
    %22 = arith.mulf %17, %21 : vector<16x16xf32>
    %cst_15 = arith.constant dense<0.000000e+00> : vector<16x16xf32>
    %23 = tpu.matmul %22, %9, %cst_15 {dimension_numbers = #tpu.dot_dimension_numbers<[1], [0], [0], [1], [0, 0, 1, 1], [], []>} : vector<16x16xf32>, vector<16x16xf32>, vector<16x16xf32> -> vector<16x16xf32>
    %c0_16 = arith.constant 0 : index
    %c0_17 = arith.constant 0 : index
    %24 = vector.load %arg4[%c0_16, %c0_17] : memref<16x16xf32, #tpu.memory_space<vmem>>, vector<16x16xf32>
    tpu.vector_store %arg4[%c0_16, %c0_17], %23 {strides = array<i32>} : memref<16x16xf32, #tpu.memory_space<vmem>>, vector<16x16xf32>,
    return
  }
  func.func @transform_0(%arg0: i32) -> (i32, i32) {
    %c0_i32 = arith.constant 0 : i32
    %c0_i32_0 = arith.constant 0 : i32
    %c0_i32_1 = arith.constant 0 : i32
    return %c0_i32, %c0_i32_0 : i32, i32
  }
  func.func @transform_1(%arg0: i32) -> (i32, i32, i32) {
    %c0_i32 = arith.constant 0 : i32
    %c0_i32_0 = arith.constant 0 : i32
    %c0_i32_1 = arith.constant 0 : i32
    %c0_i32_2 = arith.constant 0 : i32
    return %c0_i32, %c0_i32_0, %c0_i32_1 : i32, i32, i32
  }
  func.func @transform_2(%arg0: i32) -> (i32, i32) {
    %c0_i32 = arith.constant 0 : i32
    %c0_i32_0 = arith.constant 0 : i32
    %c0_i32_1 = arith.constant 0 : i32
    return %c0_i32, %c0_i32_0 : i32, i32
  }
  func.func @transform_3(%arg0: i32) -> (i32, i32) {
    %c0_i32 = arith.constant 0 : i32
    %c0_i32_0 = arith.constant 0 : i32
    %c0_i32_1 = arith.constant 0 : i32
    return %c0_i32, %c0_i32_0 : i32, i32
  }
}

</mosaic_0001>

<bundles_post_ra>
// kernel: head_forward.1
= control target key start
LH: loop header
LB: loop body
LE: loop exit
PB: predicated region body
PF: predicated region fallthrough
CT: control target
= control target key end

     0   :  { %vm21_vm0 = vcmask 261120   ;;  %s694_s0 = inlined_call_operand.vmem [shape: f32[16,32], index: 0, kind: input, shape index: {}]   ;;  %s695_s1 = inlined_call_operand.vmem [shape: f32[3,32,16], index: 1, kind: input, shape index: {}]   ;;  %s696_s2 = inlined_call_operand.vmem [shape: f32[16,16], index: 2, kind: input, shape index: {}]   ;;  %s697_s3 = inlined_call_operand.hbm [shape: f32[16,16], index: 3, kind: output, shape index: {}]  }
   0x1   :  { %v479_v0 = vld [vmem:[%s695_s1 + $0x38] sm:$0xff]  ;;  %v478_v1 = vld [vmem:[%s695_s1 + $0x30] sm:$0xff]  ;;  %v477_v4 = vld [vmem:[%s695_s1 + $0x28] sm:$0xff] }
   0x2   :  { %v20_v2 = vld [vmem:[%s695_s1 + $0x18] sm:$0xff]  ;;  %531 = vmatprep.subr.mxu1 %v479_v0  ;;  %v19_v3 = vld [vmem:[%s695_s1 + $0x10] sm:$0xff]  ;;  %v18_v5 = vld [vmem:[%s695_s1 + $0x8] sm:$0xff] }
   0x3   :  { %520 = vmatprep.subr.mxu0 %v20_v2  ;;  %532 = vmatpush3.msra.mxu1 %v479_v0  ;;  %v15_v6 = vld [vmem:[%s694_s0] sm:$0xff] }
   0x4   :  { %521 = vmatpush3.msra.mxu0 %v20_v2  ;;  %533 = vmatprep.subr.mxu1 %v478_v1 }
   0x5   :  { %522 = vmatprep.subr.mxu0 %v19_v3 }
   0x6   :  { %8 = vsyncpa [#allocation3], 0  ;;  %534 = vmatpush3.msra.mxu1 %v478_v1  ;;  %523 = vmatpush3.msra.mxu0 %v19_v3  ;;  %v476_v7 = vld [vmem:[%s695_s1 + $0x20] sm:$0xff]  ;;  %v16_v9 = vld [vmem:[%s694_s0 + $0x8] sm:$0xff]  ;;  %vm265_vm1 = vcmask 130048  }
   0x7   :  { %535 = vmatprep.subr.mxu1 %v477_v4  ;;  %524 = vmatprep.subr.mxu0 %v18_v5  ;;  %v17_v8 = vld [vmem:[%s695_s1] sm:$0xff]  ;;  %v485_v14 = vld [vmem:[%s695_s1 + $0x58] sm:$0xff]  ;;  %v484_v15 = vld [vmem:[%s695_s1 + $0x50] sm:$0xff] }
   0x8   :  { %536 = vmatpush3.msra.mxu1 %v477_v4  ;;  %539 = vmatprep.mubr.msk.f32.mxu1 %vm21_vm0, %v15_v6  ;;  %v483_v16 = vld [vmem:[%s695_s1 + $0x48] sm:$0xff]  ;;  %v482_v17 = vld [vmem:[%s695_s1 + $0x40] sm:$0xff]  ;;  %s600_s1 = smov [#allocation2]  }
   0x9   :  { %537 = vmatprep.subr.mxu1 %v476_v7  ;;  %525 = vmatpush3.msra.mxu0 %v18_v5  ;;  %v263_v19 = vld [vmem:[%s696_s2] sm:$0xff]  ;;  %v264_v20 = vld [vmem:[%s696_s2 + $0x8] sm:$0xff]  ;;  %s463_s2 = sshll.u32 %s600_s1, 4  ;;  %s464_s2 = int_to_ptr.vmem [resolvable:$true] %s463_s2 }
   0xa   :  { %538 = vmatpush3.msra.mxu1 %v476_v7  ;;  %526 = vmatprep.subr.mxu0 %v17_v8  ;;  %s578_s16 = scalar_lea.vmem %s464_s2, 256  ;;  %p583_p1 = scmp.lt.s32.totalorder %s464_s2, %s464_s2 }
   0xb   :  { %540 = vmatmul.mubr.msk.f32.vlgmr.msra.gmra.mxu1 %vm21_vm0, %v16_v9  ;;  %527 = vmatpush3.msra.mxu0 %v17_v8  ;;  %p579_p0 = scmp.ne.s32.totalorder %s464_s2, %s578_s16  ;;  %p584_p2 = scmp.lt.s32.totalorder %s578_s16, %s578_s16 }
   0xc   :  { %528 = vmatprep.mubr.msk.f32.mxu0 %vm21_vm0, %v15_v6  ;;  %542 = vmatprep.subr.mxu0 %v485_v14 }
   0xd   :  { %529 = vmatmul.mubr.msk.f32.vlgmr.msra.gmra.mxu0 %vm21_vm0, %v16_v9  ;;  %p585_p3 = por %p584_p2, %p583_p1 }
   0xe   :  { %550 = vmatprep.mubr.msk.f32.mxu0 %vm21_vm0, %v15_v6  ;;  %543 = vmatpush3.msra.mxu0 %v485_v14 }
   0xf   :  { %544 = vmatprep.subr.mxu0 %v484_v15  ;;  %p586_p4 = pnand %p585_p3, %p579_p0 }
  0x10   :  { %545 = vmatpush3.msra.mxu0 %v484_v15 }
  0x11   :  { %546 = vmatprep.subr.mxu0 %v483_v16 }
  0x12   :  { %547 = vmatpush3.msra.mxu0 %v483_v16 }
  0x13   :  { %548 = vmatprep.subr.mxu0 %v482_v17 }
  0x14   :  { %549 = vmatpush3.msra.mxu0 %v482_v17 }
  0x15   :  { %551 = vmatmul.mubr.msk.f32.vlgmr.msra.gmra.mxu0 %vm21_vm0, %v16_v9 }
  0xcb   :  { %v541_v10 = vpop.f32.mrf.mxu1 }
  0xcc   :  { %553 = vmatprep.subr.msk.mxu1 %vm265_vm1, %v541_v10 }
  0xcd   :  { %v174_v11 = vpop.f32.mrf.mxu1  ;;  %554 = vmatpush3.xpose.msk.msra.mxu1 %vm265_vm1, %v541_v10  ;;  %v530_v12 = vpop.f32.mrf.mxu0 }
  0xce   :  { %555 = vmatprep.subr.msk.mxu1 %vm265_vm1, %v174_v11 }
  0xcf   :  { %v94_v13 = vpop.f32.mrf.mxu0 }
  0xd0   :  { %557 = vmatprep.mubr.msk.f32.mxu1 %vm265_vm1, %v94_v13 }
  0xd1   :  { %556 = vmatpush3.xpose.msk.msra.mxu1 %vm265_vm1, %v174_v11 }
  0xd4   :  { %558 = vmatmul.mubr.msk.f32.vlgmr.msra.gmra.mxu1 %vm265_vm1, %v530_v12 }
  0xd5   :  { %v552_v36 = vpop.f32.mrf.mxu0 }
  0xd6   :  { %560 = vmatprep.subr.mxu0 %v552_v36 }
  0xd7   :  { %v254_v37 = vpop.f32.mrf.mxu0  ;;  %561 = vmatpush3.msra.mxu0 %v552_v36 }
  0xd8   :  { %562 = vmatprep.subr.mxu0 %v254_v37 }
  0xd9   :  { %563 = vmatpush3.msra.mxu0 %v254_v37 }
 0x194   :  { %v559_v18 = vpop.f32.mrf.mxu1 }
 0x195   :  { %v350_v23 = vadd.f32 %v559_v18, %v264_v20 }
 0x196   :  { %v344_v21 = vpop.f32.mrf.mxu1 }
 0x197   :  { %v345_v22 = vadd.f32 %v344_v21, %v263_v19  ;;  %v356_v25 = vsel %vm265_vm1, %v350_v23, -inf }
 0x199   :  { %v353_v24 = vsel %vm265_vm1, %v345_v22, -inf }
 0x19a   :  { %354 = vmax.xlane.f32.xlu0 %v353_v24 }
 0x19e   :  { %357 = vmax.xlane.f32.xlu0 %v356_v25 }
 0x223   :  { %v355_v26 = vpop.xlane.xlu0 %354 }
 0x224   :  { %v359_v27 = vsub.f32 %v345_v22, %v355_v26 }
 0x226   :  { %v361_v28 = vmul.f32 1.442695, %v359_v27 }
 0x227   :  { %v358_v29 = vpop.xlane.xlu0 %357 }
 0x228   :  { %570 = vpow2.f32 %v361_v28  ;;  %v360_v30 = vsub.f32 %v350_v23, %v358_v29 }
 0x22a   :  { %v363_v31 = vmul.f32 1.442695, %v360_v30 }
 0x22c   :  { %572 = vpow2.f32 %v363_v31 }
 0x235   :  { %v571_v32 = vpop.eup %570 }
 0x236   :  { %v365_v33 = vsel %vm265_vm1, %v571_v32, 0.0 }
 0x237   :  { %366 = vadd.xlane.f32.xlu1 %v365_v33 }
 0x239   :  { %v573_v34 = vpop.eup %572 }
 0x23a   :  { %v368_v35 = vsel %vm265_vm1, %v573_v34, 0.0 }
 0x23b   :  { %369 = vadd.xlane.f32.xlu1 %v368_v35 }
 0x2c0   :  { %v367_v38 = vpop.xlane.xlu1 %366 }
 0x2c1   :  { %574 = vrcp.f32 %v367_v38 }
 0x2c4   :  { %v370_v39 = vpop.xlane.xlu1 %369 }
 0x2c5   :  { %576 = vrcp.f32 %v370_v39 }
 0x2ce   :  { %v575_v40 = vpop.eup %574 }
 0x2cf   :  { %v373_v41 = vmul.f32 %v575_v40, %v571_v32 }
 0x2d1   :  { %564 = vmatprep.mubr.msk.f32.mxu0 %vm265_vm1, %v373_v41 }
 0x2d2   :  { %v577_v42 = vpop.eup %576 }
 0x2d3   :  { %v374_v43 = vmul.f32 %v577_v42, %v573_v34 }
 0x2d5   :  { %565 = vmatmul.mubr.msk.f32.vlgmr.msra.gmra.mxu0 %vm265_vm1, %v374_v43 }
 0x395   :  { %v566_v44 = vpop.f32.mrf.mxu0 }
 0x396   :  { %457 = vst.msk [vmem:[#allocation2 + $0x8] sm:$0xff] %vm265_vm1, %v566_v44 }
 0x397   :  { %v447_v45 = vpop.f32.mrf.mxu0 }
 0x398   :  { %456 = vst.msk [vmem:[#allocation2] sm:$0xff] %vm265_vm1, %v447_v45 }
 0x399   :  { %589 = shalt.err (!%p586_p4)
}
 0x39a   :  { %s601_s17 = smov 128   ;;  %s602_s18 = smov 8  }
 0x39b   :  { %469 = dma.vmem_to_hbm [thread:$0]  %s464_s2, 256, %s697_s3, [#allocation3], %s601_s17, %s601_s17, %s602_s18  }
 0x39c   :  { %598 = dma.done.wait [#allocation3], 256  }
 0x39d   :  { %599 = vsyncadd [#allocation3], 4294967040 }
 0x39e   :  { %473 = vsyncpa [#allocation3], 1 }

</bundles_post_ra>
